<compile_context>
chip_gen: v7x
topology: tpu7x:2x2x1
jax: 0.10.0
libtpu: 0.0.40
codegen_flags: <defaults>
</compile_context>

<pallas_src>
import jax
import jax.numpy as jnp
from jax.experimental import pallas as pl
from jax.experimental.pallas import tpu as pltpu


def policy_kernel(x_ref, w1_ref, b1_ref, w23_ref, b23_ref, o_ref):
    # Feature-major: x_ref is (num_input, bb); weights are (out_feat, in_feat).
    # Linear1 on the MXU (bf16 in, f32 accumulate) + bias + ReLU on the VPU.
    h = jnp.dot(w1_ref[...], x_ref[...], preferred_element_type=jnp.float32)
    h = jnp.maximum(h + b1_ref[...], 0.0)                       # (hidden, bb) f32
    # Fused Linear2·Linear3: a single MXU pass over the pre-fused (16, hidden) weight.
    z = jnp.dot(w23_ref[...], h.astype(w23_ref.dtype),
                preferred_element_type=jnp.float32) + b23_ref[...]  # (16, bb) f32
    # Numerically stable log-softmax over the feature (sublane) axis.
    # exp/log go to the EUP slot; the reduction is a cheap sublane XLU reduce.
    m = jnp.max(z, axis=0, keepdims=True)
    lse = jnp.log(jnp.sum(jnp.exp(z - m), axis=0, keepdims=True)) + m
    o_ref[...] = (z - lse).astype(o_ref.dtype)


def fuse_params(params, matmul_dtype=jnp.bfloat16):
    """Fold Linear2/Linear3 (no nonlinearity between) and convert to the
    feature-major kernel layout: (out_features, in_features) weights and
    (out_features, 1) biases. Fusion is done in f32, then weights are cast."""
    w1, b1, w2, b2, w3, b3 = params           # (in,out) weights, (1,out) biases
    w23 = w2 @ w3
    b23 = b2 @ w3 + b3
    return (w1.T.astype(matmul_dtype), b1.T.astype(jnp.float32),
            w23.T.astype(matmul_dtype), b23.T.astype(jnp.float32))


def _round_up(n, m):
    return ((n + m - 1) // m) * m


def policy_network_forward(x, fused_params, *, block_b=2048):
    """x: (B, num_input) f32. Returns (B, 16) f32 log-probabilities."""
    w1, b1, w23, b23 = fused_params
    B, num_input = x.shape
    hidden = w1.shape[0]
    out_dim = w23.shape[0]
    matmul_dtype = w1.dtype

    # Batch-tile selection (bb is the lane axis of every vreg):
    #   * B <= 128: a single whole-batch block (bb == full dim is always legal).
    #   * otherwise: at least two 128-aligned blocks so the "parallel" batch axis
    #     can feed both v7x TensorCores, with an (approximately) even block count
    #     when the batch spans more than two default tiles.
    block_b = max(128, _round_up(block_b, 128))
    if B <= 128:
        bb = B
    else:
        nblk = max(2, pl.cdiv(B, block_b))
        nblk += nblk & 1                       # even block count -> balanced TCs
        bb = min(block_b, _round_up(pl.cdiv(B, nblk), 128))
    grid = (pl.cdiv(B, bb),)

    # Transpose + cast once in the wrapper: activations become (features, batch).
    x_t = x.T.astype(matmul_dtype)             # (num_input, B)

    it = jnp.dtype(matmul_dtype).itemsize
    flops = 2 * B * (num_input * hidden + hidden * out_dim)
    bytes_accessed = (B * num_input * it + B * out_dim * 4
                      + hidden * num_input * it + hidden * 4
                      + out_dim * hidden * it + out_dim * 4)
    cost = pl.CostEstimate(flops=flops,
                           transcendentals=B * (out_dim + 1),
                           bytes_accessed=bytes_accessed)

    grid_spec = pltpu.PrefetchScalarGridSpec(
        num_scalar_prefetch=0,
        grid=grid,
        in_specs=[
            pl.BlockSpec((num_input, bb), lambda i: (0, i)),      # x^T tile (pipelined)
            pl.BlockSpec((hidden, num_input), lambda i: (0, 0)),  # w1   (VMEM-resident)
            pl.BlockSpec((hidden, 1), lambda i: (0, 0)),          # b1   (VMEM-resident)
            pl.BlockSpec((out_dim, hidden), lambda i: (0, 0)),    # w23  (VMEM-resident)
            pl.BlockSpec((out_dim, 1), lambda i: (0, 0)),         # b23  (VMEM-resident)
        ],
        out_specs=pl.BlockSpec((out_dim, bb), lambda i: (0, i)),  # lane-dense output
    )

    out_t = pl.pallas_call(
        policy_kernel,
        out_shape=jax.ShapeDtypeStruct((out_dim, B), jnp.float32),
        grid_spec=grid_spec,
        compiler_params=pltpu.CompilerParams(dimension_semantics=("parallel",)),
        cost_estimate=cost,
    )(x_t, w1, b1, w23, b23)

    return out_t.T                              # (B, out_dim) log-probabilities


def init_params(key, num_input, num_output, num_hidden=64, final_dim=16):
    ks = jax.random.split(key, 6)

    # Deterministic synthetic init (PyTorch-style uniform fan-in scaling),
    # stored as (in_features, out_features) weights and (1, out_features) biases.
    def lin(kw, kb, fan_in, fan_out):
        bound = 1.0 / jnp.sqrt(fan_in)
        w = jax.random.uniform(kw, (fan_in, fan_out), jnp.float32, -bound, bound)
        b = jax.random.uniform(kb, (1, fan_out), jnp.float32, -bound, bound)
        return w, b

    w1, b1 = lin(ks[0], ks[1], num_input, num_hidden)
    w2, b2 = lin(ks[2], ks[3], num_hidden, num_output)
    w3, b3 = lin(ks[4], ks[5], num_output, final_dim)
    return (w1, b1, w2, b2, w3, b3)


def reference_forward(x, params):
    # Unfused f32 reference: exactly the original module's op sequence.
    w1, b1, w2, b2, w3, b3 = params
    h = jnp.maximum(x @ w1 + b1, 0.0)
    h = h @ w2 + b2
    z = h @ w3 + b3
    return jax.nn.log_softmax(z, axis=-1)


if __name__ == "__main__":
    key = jax.random.PRNGKey(0)
    k_x, k_p, k_x2 = jax.random.split(key, 3)

    batch, num_input, num_output = 8, 32, 8
    params = init_params(k_p, num_input, num_output)

    # --- f32 path: tight-tolerance check of the kernel math (single block). ---
    fused_f32 = fuse_params(params, matmul_dtype=jnp.float32)
    x = jax.random.normal(k_x, (batch, num_input), jnp.float32)
    out = jax.block_until_ready(policy_network_forward(x, fused_f32))
    ref = reference_forward(x, params)
    assert out.shape == (batch, 16)
    assert jnp.allclose(out, ref, atol=2e-5, rtol=1e-5), \
        float(jnp.max(jnp.abs(out - ref)))

    # --- bf16 fast path + batch tiling (>=2 lane-aligned blocks, ragged tail). ---
    fused_bf16 = fuse_params(params, matmul_dtype=jnp.bfloat16)
    big_batch = 1000
    x_big = jax.random.normal(k_x2, (big_batch, num_input), jnp.float32)
    out_big = jax.block_until_ready(
        policy_network_forward(x_big, fused_bf16, block_b=2048))
    ref_big = reference_forward(x_big, params)
    assert out_big.shape == (big_batch, 16)
    # bf16 matmul inputs change results at the ~1e-3 level; loosened tolerance.
    assert jnp.allclose(out_big, ref_big, atol=2e-2, rtol=2e-2), \
        float(jnp.max(jnp.abs(out_big - ref_big)))

    print("KERNEL_OK")
</pallas_src>

<mosaic_0001>
module attributes {stable_mosaic.version = 11 : i64} {
  func.func @policy_kernel(%arg0: i32, %arg1: memref<32x8xf32, #tpu.memory_space<vmem>>, %arg2: memref<64x32xf32, #tpu.memory_space<vmem>>, %arg3: memref<64x1xf32, #tpu.memory_space<vmem>>, %arg4: memref<16x64xf32, #tpu.memory_space<vmem>>, %arg5: memref<16x1xf32, #tpu.memory_space<vmem>>, %arg6: memref<16x8xf32, #tpu.memory_space<vmem>>) attributes {dimension_semantics = [#tpu.dimension_semantics<parallel>], iteration_bounds = array<i64: 1>, scalar_prefetch = 0 : i64, scratch_operands = 0 : i64, tpu.core_type = #tpu.core_type<tc>, window_params = [{transform_indices = @transform_0, window_bounds = array<i64: 32, 8>}, {pipeline_mode = #tpu.pipeline_mode<synchronous>, transform_indices = @transform_1, window_bounds = array<i64: 64, 32>}, {pipeline_mode = #tpu.pipeline_mode<synchronous>, transform_indices = @transform_2, window_bounds = array<i64: 64, 1>}, {pipeline_mode = #tpu.pipeline_mode<synchronous>, transform_indices = @transform_3, window_bounds = array<i64: 16, 64>}, {pipeline_mode = #tpu.pipeline_mode<synchronous>, transform_indices = @transform_4, window_bounds = array<i64: 16, 1>}, {transform_indices = @transform_5, window_bounds = array<i64: 16, 8>}]} {
    %c0 = arith.constant 0 : index
    %c0_0 = arith.constant 0 : index
    %0 = vector.load %arg2[%c0, %c0_0] : memref<64x32xf32, #tpu.memory_space<vmem>>, vector<64x32xf32>
    %c0_1 = arith.constant 0 : index
    %c0_2 = arith.constant 0 : index
    %1 = vector.load %arg1[%c0_1, %c0_2] : memref<32x8xf32, #tpu.memory_space<vmem>>, vector<32x8xf32>
    %cst = arith.constant dense<0.000000e+00> : vector<64x8xf32>
    %2 = tpu.matmul %0, %1, %cst {dimension_numbers = #tpu.dot_dimension_numbers<[1], [0], [0], [1], [0, 0, 1, 1], [], []>} : vector<64x32xf32>, vector<32x8xf32>, vector<64x8xf32> -> vector<64x8xf32>
    %c0_3 = arith.constant 0 : index
    %c0_4 = arith.constant 0 : index
    %3 = vector.load %arg3[%c0_3, %c0_4] : memref<64x1xf32, #tpu.memory_space<vmem>>, vector<64x1xf32>
    %4 = vector.broadcast %3 : vector<64x1xf32> to vector<64x8xf32>
    %5 = arith.addf %2, %4 : vector<64x8xf32>
    %cst_5 = arith.constant 0.000000e+00 : f32
    %6 = vector.broadcast %cst_5 : f32 to vector<64x8xf32>
    %7 = arith.maximumf %5, %6 : vector<64x8xf32>
    %c0_6 = arith.constant 0 : index
    %c0_7 = arith.constant 0 : index
    %8 = vector.load %arg4[%c0_6, %c0_7] : memref<16x64xf32, #tpu.memory_space<vmem>>, vector<16x64xf32>
    %cst_8 = arith.constant dense<0.000000e+00> : vector<16x8xf32>
    %9 = tpu.matmul %8, %7, %cst_8 {dimension_numbers = #tpu.dot_dimension_numbers<[1], [0], [0], [1], [0, 0, 1, 1], [], []>} : vector<16x64xf32>, vector<64x8xf32>, vector<16x8xf32> -> vector<16x8xf32>
    %c0_9 = arith.constant 0 : index
    %c0_10 = arith.constant 0 : index
    %10 = vector.load %arg5[%c0_9, %c0_10] : memref<16x1xf32, #tpu.memory_space<vmem>>, vector<16x1xf32>
    %11 = vector.broadcast %10 : vector<16x1xf32> to vector<16x8xf32>
    %12 = arith.addf %9, %11 : vector<16x8xf32>
    %cst_11 = arith.constant dense<0xFF800000> : vector<8xf32>
    %13 = vector.multi_reduction <maximumf>, %12, %cst_11 [0] : vector<16x8xf32> to vector<8xf32>
    %14 = vector.shape_cast %13 : vector<8xf32> to vector<1x8xf32>
    %15 = vector.broadcast %14 : vector<1x8xf32> to vector<16x8xf32>
    %16 = arith.subf %12, %15 : vector<16x8xf32>
    %17 = math.exp %16 : vector<16x8xf32>
    %cst_12 = arith.constant dense<0.000000e+00> : vector<8xf32>
    %18 = vector.multi_reduction <add>, %17, %cst_12 [0] : vector<16x8xf32> to vector<8xf32>
    %19 = vector.shape_cast %18 : vector<8xf32> to vector<1x8xf32>
    %20 = math.log %19 : vector<1x8xf32>
    %21 = arith.addf %20, %14 : vector<1x8xf32>
    %22 = vector.broadcast %21 : vector<1x8xf32> to vector<16x8xf32>
    %23 = arith.subf %12, %22 : vector<16x8xf32>
    %c0_13 = arith.constant 0 : index
    %c0_14 = arith.constant 0 : index
    %24 = vector.load %arg6[%c0_13, %c0_14] : memref<16x8xf32, #tpu.memory_space<vmem>>, vector<16x8xf32>
    tpu.vector_store %arg6[%c0_13, %c0_14], %23 {strides = array<i32>} : memref<16x8xf32, #tpu.memory_space<vmem>>, vector<16x8xf32>,
    return
  }
  func.func @transform_0(%arg0: i32) -> (i32, i32) {
    %c0_i32 = arith.constant 0 : i32
    %c0_i32_0 = arith.constant 0 : i32
    return %c0_i32, %arg0 : i32, i32
  }
  func.func @transform_1(%arg0: i32) -> (i32, i32) {
    %c0_i32 = arith.constant 0 : i32
    %c0_i32_0 = arith.constant 0 : i32
    %c0_i32_1 = arith.constant 0 : i32
    return %c0_i32, %c0_i32_0 : i32, i32
  }
  func.func @transform_2(%arg0: i32) -> (i32, i32) {
    %c0_i32 = arith.constant 0 : i32
    %c0_i32_0 = arith.constant 0 : i32
    %c0_i32_1 = arith.constant 0 : i32
    return %c0_i32, %c0_i32_0 : i32, i32
  }
  func.func @transform_3(%arg0: i32) -> (i32, i32) {
    %c0_i32 = arith.constant 0 : i32
    %c0_i32_0 = arith.constant 0 : i32
    %c0_i32_1 = arith.constant 0 : i32
    return %c0_i32, %c0_i32_0 : i32, i32
  }
  func.func @transform_4(%arg0: i32) -> (i32, i32) {
    %c0_i32 = arith.constant 0 : i32
    %c0_i32_0 = arith.constant 0 : i32
    %c0_i32_1 = arith.constant 0 : i32
    return %c0_i32, %c0_i32_0 : i32, i32
  }
  func.func @transform_5(%arg0: i32) -> (i32, i32) {
    %c0_i32 = arith.constant 0 : i32
    %c0_i32_0 = arith.constant 0 : i32
    return %c0_i32, %arg0 : i32, i32
  }
}

</mosaic_0001>

<bundles_post_ra>
// kernel: tpu_custom_call.1
= control target key start
LH: loop header
LB: loop body
LE: loop exit
PB: predicated region body
PF: predicated region fallthrough
CT: control target
= control target key end

     0   :  { %vm80_vm0 = vcmask 261120   ;;  %v454_v3 = vmov 0   ;;  %vm232_vm1 = vcmask 523264   ;;  %vm314_vm2 = vcmask 64512   ;;  %s579_s0 = inlined_call_operand.vmem [shape: f32[32,8], index: 0, kind: input, shape index: {}]   ;;  %s580_s1 = inlined_call_operand.vmem [shape: f32[64,32], index: 1, kind: input, shape index: {}]   ;;  %s581_s2 = inlined_call_operand.vmem [shape: f32[64,1], index: 2, kind: input, shape index: {}]   ;;  %s582_s4 = inlined_call_operand.vmem [shape: f32[16,1], index: 4, kind: input, shape index: {}]   ;;  %s583_s3 = inlined_call_operand.vmem [shape: f32[16,64], index: 3, kind: input, shape index: {}]   ;;  %s584_s5 = inlined_call_operand.vmem [shape: f32[16,8], index: 5, kind: output, shape index: {}]  }
   0x1   :  { %v28_v0 = vld [vmem:[%s579_s0] sm:$0xff]  ;;  %v29_v1 = vld [vmem:[%s579_s0 + $0x8] sm:$0xff]  ;;  %v30_v2 = vld [vmem:[%s579_s0 + $0x10] sm:$0xff]  ;;  %446 = vset.pattern.permute.xlu0 %v454_v3  ;;  %447 = vset.pattern.permute.xlu1 %v454_v3 }
   0x2   :  { %v421_v4 = vpack.c.bf16 %v29_v1, %v28_v0  ;;  %v31_v5 = vld [vmem:[%s579_s0 + $0x18] sm:$0xff]  ;;  %v20_v6 = vld [vmem:[%s580_s1] sm:$0xff]  ;;  %v34_v9 = vld [vmem:[%s581_s2 + $0x10] sm:$0xff] }
   0x3   :  { %v425_v7 = vpack.c.bf16 %v31_v5, %v30_v2  ;;  %390 = vmatprep.mubr.msk.f32.mxu0 %vm80_vm0, %v20_v6  ;;  %v32_v8 = vld [vmem:[%s581_s2] sm:$0xff]  ;;  %52 = vperm.xlu1 %447, %v34_v9   ;;  %v33_v10 = vld [vmem:[%s581_s2 + $0x8] sm:$0xff]  ;;  %v35_v11 = vld [vmem:[%s581_s2 + $0x18] sm:$0xff] }
   0x4   :  { %422 = vmatprep.subr.bf16.mxu0 %v421_v4  ;;  %42 = vperm.xlu0 %446, %v32_v8   ;;  %v21_v12 = vld [vmem:[%s580_s1 + $0x8] sm:$0xff]  ;;  %v22_v13 = vld [vmem:[%s580_s1 + $0x10] sm:$0xff]  ;;  %v36_v14 = vld [vmem:[%s581_s2 + $0x20] sm:$0xff] }
   0x5   :  { %424 = vmatpush3.bf16.msra.mxu0 %v421_v4  ;;  %v37_v15 = vld [vmem:[%s581_s2 + $0x28] sm:$0xff]  ;;  %v23_v16 = vld [vmem:[%s580_s1 + $0x18] sm:$0xff]  ;;  %v24_v17 = vld [vmem:[%s580_s1 + $0x20] sm:$0xff] }
   0x6   :  { %426 = vmatprep.subr.bf16.mxu0 %v425_v7  ;;  %v38_v18 = vld [vmem:[%s581_s2 + $0x30] sm:$0xff]  ;;  %v39_v19 = vld [vmem:[%s581_s2 + $0x38] sm:$0xff]  ;;  %v25_v20 = vld [vmem:[%s580_s1 + $0x28] sm:$0xff] }
   0x7   :  { %57 = vperm.xlu1 %447, %v35_v11   ;;  %v26_v21 = vld [vmem:[%s580_s1 + $0x30] sm:$0xff]  ;;  %v220_v22 = vld [vmem:[%s582_s4] sm:$0xff]  ;;  %v221_v23 = vld [vmem:[%s582_s4 + $0x8] sm:$0xff] }
   0x8   :  { %47 = vperm.xlu0 %446, %v33_v10   ;;  %v27_v24 = vld [vmem:[%s580_s1 + $0x38] sm:$0xff]  ;;  %v218_v25 = vld [vmem:[%s583_s3] sm:$0xff]  ;;  %v219_v62 = vld [vmem:[%s583_s3 + $0x8] sm:$0xff] }
   0x9   :  { %428 = vmatpush3.bf16.msra.mxu0 %v425_v7  ;;  %418 = vmatprep.mubr.msk.f32.mxu1 %vm232_vm1, %v218_v25 }
   0xb   :  { %67 = vperm.xlu1 %447, %v37_v15  }
   0xc   :  { %391 = vmatmul.mubr.msk.f32.vlgmr.msra.gmra.mrb[0].mxu0 %vm80_vm0, %v21_v12  ;;  %62 = vperm.xlu0 %446, %v36_v14  }
   0xd   :  { %393 = vmatprep.mubr.msk.f32.mxu0 %vm80_vm0, %v22_v13 }
   0xf   :  { %77 = vperm.xlu1 %447, %v39_v19  }
  0x10   :  { %394 = vmatmul.mubr.msk.f32.gmra.mrb[2].mxu0 %vm80_vm0, %v23_v16  ;;  %72 = vperm.xlu0 %446, %v38_v18  }
  0x11   :  { %396 = vmatprep.mubr.msk.f32.mxu0 %vm80_vm0, %v24_v17 }
  0x13   :  { %229 = vperm.xlu1 %447, %v221_v23  }
  0x14   :  { %397 = vmatmul.mubr.msk.f32.gmra.mrb[4].mxu0 %vm80_vm0, %v25_v20  ;;  %224 = vperm.xlu0 %446, %v220_v22  }
  0x15   :  { %399 = vmatprep.mubr.msk.f32.mxu0 %vm80_vm0, %v26_v21 }
  0x18   :  { %400 = vmatmul.mubr.msk.f32.gmra.mrb[6].mxu0 %vm80_vm0, %v27_v24 }
  0x82   :  { %v53_v27 = vpop.permute.xlu1 %52 }
  0x83   :  { %v43_v26 = vpop.permute.xlu0 %42 }
  0x86   :  { %v58_v29 = vpop.permute.xlu1 %57 }
  0x87   :  { %v48_v28 = vpop.permute.xlu0 %47 }
  0x8a   :  { %v68_v39 = vpop.permute.xlu1 %67 }
  0x8b   :  { %v63_v42 = vpop.permute.xlu0 %62 }
  0x8e   :  { %v78_v51 = vpop.permute.xlu1 %77 }
  0x8f   :  { %v73_v54 = vpop.permute.xlu0 %72 }
  0x92   :  { %v230_v63 = vpop.permute.xlu1 %229 }
  0x93   :  { %v225_v1 = vpop.permute.xlu0 %224 }
  0xdf   :  { %v392_v30 = vpop.f32.mrb[0].mxu0 }
  0xe0   :  { %v177_v31 = vadd.f32 %v392_v30, %v48_v28  ;;  %v171_v32 = vpop.f32.mrb[1].mxu0 }
  0xe1   :  { %v172_v33 = vadd.f32 %v171_v32, %v43_v26 }
  0xe2   :  { %v211_v34 = vmax.f32 %v177_v31, 0.0 }
  0xe3   :  { %v210_v35 = vmax.f32 %v172_v33, 0.0  ;;  %v395_v36 = vpop.f32.mrb[2].mxu0 }
  0xe4   :  { %v187_v37 = vadd.f32 %v395_v36, %v58_v29  ;;  %v181_v38 = vpop.f32.mrb[3].mxu0 }
  0xe5   :  { %v182_v40 = vadd.f32 %v181_v38, %v53_v27  ;;  %v429_v41 = vpack.c.bf16 %v211_v34, %v210_v35 }
  0xe6   :  { %v213_v43 = vmax.f32 %v187_v37, 0.0 }
  0xe7   :  { %v212_v44 = vmax.f32 %v182_v40, 0.0  ;;  %v398_v45 = vpop.f32.mrb[4].mxu0  ;;  %430 = vmatprep.subr.bf16.mxu1 %v429_v41 }
  0xe8   :  { %v197_v46 = vadd.f32 %v398_v45, %v68_v39  ;;  %v191_v47 = vpop.f32.mrb[5].mxu0  ;;  %432 = vmatpush3.bf16.msra.mxu1 %v429_v41 }
  0xe9   :  { %v433_v48 = vpack.c.bf16 %v213_v43, %v212_v44  ;;  %v192_v49 = vadd.f32 %v191_v47, %v63_v42 }
  0xea   :  { %v215_v50 = vmax.f32 %v197_v46, 0.0 }
  0xeb   :  { %v214_v52 = vmax.f32 %v192_v49, 0.0  ;;  %v401_v53 = vpop.f32.mrb[6].mxu0  ;;  %434 = vmatprep.subr.bf16.mxu1 %v433_v48 }
  0xec   :  { %v207_v55 = vadd.f32 %v401_v53, %v78_v51  ;;  %v201_v56 = vpop.f32.mrb[7].mxu0  ;;  %436 = vmatpush3.bf16.msra.mxu1 %v433_v48 }
  0xed   :  { %v437_v57 = vpack.c.bf16 %v215_v50, %v214_v52  ;;  %v202_v58 = vadd.f32 %v201_v56, %v73_v54 }
  0xee   :  { %v217_v59 = vmax.f32 %v207_v55, 0.0 }
  0xef   :  { %v216_v60 = vmax.f32 %v202_v58, 0.0  ;;  %438 = vmatprep.subr.bf16.mxu1 %v437_v57 }
  0xf0   :  { %440 = vmatpush3.bf16.msra.mxu1 %v437_v57 }
  0xf1   :  { %v441_v61 = vpack.c.bf16 %v217_v59, %v216_v60 }
  0xf3   :  { %442 = vmatprep.subr.bf16.mxu1 %v441_v61 }
  0xf4   :  { %444 = vmatpush3.bf16.msra.mxu1 %v441_v61 }
  0xf7   :  { %419 = vmatmul.mubr.msk.f32.vlgmr.msra.gmra.mrb[0].mxu1 %vm232_vm1, %v219_v62 }
 0x1ca   :  { %v420_v0 = vpop.f32.mrb[0].mxu1 }
 0x1cb   :  { %v311_v2 = vadd.f32 %v420_v0, %v230_v63  ;;  %v305_v3 = vpop.f32.mrb[1].mxu1 }
 0x1cc   :  { %v306_v4 = vadd.f32 %v305_v3, %v225_v1 }
 0x1cd   :  { %v316_v5 = vsel %vm314_vm2, %v311_v2, -inf }
 0x1ce   :  { %v315_v6 = vsel %vm314_vm2, %v306_v4, -inf }
 0x1cf   :  { %v317_v7 = vmax.f32 %v315_v6, %v316_v5 }
 0x1d1   :  { %v318_v8 = vrot.slane %v317_v7, 4 }
 0x1d3   :  { %v319_v9 = vmax.f32 %v317_v7, %v318_v8 }
 0x1d5   :  { %v320_v10 = vrot.slane %v319_v9, 2 }
 0x1d7   :  { %v321_v11 = vmax.f32 %v319_v9, %v320_v10 }
 0x1d9   :  { %v322_v12 = vrot.slane %v321_v11, 1 }
 0x1db   :  { %v323_v13 = vmax.f32 %v321_v11, %v322_v12 }
 0x1dd   :  { %v324_v14 = vsub.f32 %v306_v4, %v323_v13  ;;  %v325_v15 = vsub.f32 %v311_v2, %v323_v13 }
 0x1df   :  { %v326_v16 = vmul.f32 1.442695, %v324_v14  ;;  %v328_v17 = vmul.f32 1.442695, %v325_v15 }
 0x1e1   :  { %448 = vpow2.f32 %v326_v16 }
 0x1e2   :  { %450 = vpow2.f32 %v328_v17 }
 0x1eb   :  { %v449_v18 = vpop.eup %448 }
 0x1ec   :  { %v451_v19 = vpop.eup %450  ;;  %v330_v20 = vsel %vm314_vm2, %v449_v18, 0.0 }
 0x1ed   :  { %v331_v21 = vsel %vm314_vm2, %v451_v19, 0.0 }
 0x1ee   :  { %v332_v22 = vadd.f32 %v331_v21, %v330_v20 }
 0x1f0   :  { %v333_v23 = vrot.slane %v332_v22, 4 }
 0x1f2   :  { %v334_v24 = vadd.f32 %v333_v23, %v332_v22 }
 0x1f4   :  { %v335_v25 = vrot.slane %v334_v24, 2 }
 0x1f6   :  { %v336_v26 = vadd.f32 %v335_v25, %v334_v24 }
 0x1f8   :  { %v337_v27 = vrot.slane %v336_v26, 1 }
 0x1fa   :  { %v338_v28 = vadd.f32 %v337_v27, %v336_v26 }
 0x1fc   :  { %452 = vlog2.f32 %v338_v28 }
 0x206   :  { %v453_v29 = vpop.eup %452 }
 0x207   :  { %v340_v30 = vmul.f32 0.6931472, %v453_v29 }
 0x209   :  { %v341_v31 = vadd.f32 %v340_v30, %v323_v13 }
 0x20b   :  { %v342_v32 = vsub.f32 %v306_v4, %v341_v31  ;;  %v343_v33 = vsub.f32 %v311_v2, %v341_v31 }
 0x20d   :  { %344 = vst.msk [vmem:[%s584_s5] sm:$0xff] %vm314_vm2, %v342_v32  ;;  %345 = vst.msk [vmem:[%s584_s5 + $0x8] sm:$0xff] %vm314_vm2, %v343_v33 }

</bundles_post_ra>
